<compile_context>
chip_gen: v5e
topology: v5e:2x2
jax: 0.10.0
libtpu: 0.0.40
codegen_flags: <defaults>
</compile_context>

<pallas_src>
import functools

import jax
import jax.numpy as jnp
from jax import lax
from jax.experimental import pallas as pl
from jax.experimental.pallas import tpu as pltpu


def make_transition_kernel(bn_type: str, eps: float, h_tile: int, width: int):
    """Fused norm + relu + 2x2-avg-pool + 1x1-conv kernel (one spatial tile)."""
    half_h = h_tile // 2
    half_w = width // 2

    def kernel(x_ref, g_ref, b_ref, w_ref, o_ref):
        # x_ref : (1, Cin, Lt)        Lt = h_tile * W, lane-dense spatial axis
        # g_ref : (Cin, 1) for 'bn' (folded scale)  or (Cin, H*W) for 'ln'
        # b_ref : (Cin, 1) for 'bn' (folded shift)  or (Cin, H*W) for 'ln'
        # w_ref : (Cout, Cin)         1x1 conv weight with 0.25 pre-folded
        # o_ref : (1, Cout, Pt)       Pt = (h_tile//2) * (W//2)
        x = x_ref[0].astype(jnp.float32)                 # (Cin, Lt) lane-dense
        cin = x.shape[0]

        if bn_type == "bn":
            a = x * g_ref[...] + b_ref[...]
        else:  # 'ln': normalize over the whole (Cin, H, W) slab, one-pass stats
            mu = jnp.mean(x)
            var = jnp.mean(x * x) - mu * mu              # biased var (PyTorch LN)
            inv = lax.rsqrt(var + eps)
            a = (x - mu) * inv * g_ref[...] + b_ref[...]

        a = jnp.maximum(a, 0.0)                          # ReLU (f32, lane-dense)

        # Channels-last inside VMEM (XLU relayout; replaces the old HBM transpose).
        at = a.T                                         # (Lt, Cin)

        # 2x2 average pool BEFORE the 1x1 conv; 0.25 is folded into w_ref.
        s = at.reshape(half_h, 2, width, cin).sum(axis=1)    # pool along H
        s = s.reshape(half_h, half_w, 2, cin).sum(axis=2)    # pool along W
        p = s.reshape(half_h * half_w, cin)                  # (Pt, Cin)

        # 1x1 conv on the (4x smaller) pooled activation; bf16 MXU path when the
        # layer runs in bf16, f32 otherwise.  Output is produced channel-first.
        y = lax.dot_general(
            w_ref[...], p.astype(w_ref.dtype),
            dimension_numbers=(((1,), (1,)), ((), ())),
            preferred_element_type=jnp.float32)              # (Cout, Pt)
        o_ref[0] = y.astype(o_ref.dtype)

    return kernel


def _choose_h_tile(H, W, cin, itemsize, max_tile_bytes=2 << 20):
    """Largest even H-tile whose blocks are lane-aligned and fit the budget."""
    full_l, full_p = H * W, (H // 2) * (W // 2)
    cands = []
    for ht in range(2, H + 1, 2):
        if H % ht:
            continue
        lt, pt = ht * W, (ht // 2) * (W // 2)
        if (lt == full_l or lt % 128 == 0) and (pt == full_p or pt % 128 == 0):
            cands.append(ht)
    if not cands:
        return H
    fitting = [ht for ht in cands if cin * ht * W * itemsize <= max_tile_bytes]
    return max(fitting) if fitting else min(cands)


def transition_forward(x_nchw, params, bn_type="bn", eps=1e-5, h_tile=None):
    """Pallas implementation of Transition.forward. Input/output are NCHW."""
    N, Cin, H, W = x_nchw.shape
    assert H % 2 == 0 and W % 2 == 0
    conv_w = params["conv_w"]                            # (Cout, Cin), 1x1 squeezed
    Cout = conv_w.shape[0]
    in_dtype = x_nchw.dtype

    # Fold the 0.25 avg-pool scale into the conv weight; bf16 MXU for bf16 inputs.
    w_dtype = jnp.bfloat16 if in_dtype == jnp.bfloat16 else jnp.float32
    w_k = (conv_w.astype(jnp.float32) * 0.25).astype(w_dtype)

    # NCHW consumed directly; contiguous reshape is free (no transpose, no upcast).
    x3 = x_nchw.reshape(N, Cin, H * W)

    if bn_type == "bn":
        # Inference BN: fold running stats + affine into per-channel scale/shift.
        scale = params["gamma"] / jnp.sqrt(params["running_var"] + eps)
        shift = params["beta"] - params["running_mean"] * scale
        g = scale.reshape(Cin, 1).astype(jnp.float32)
        b = shift.reshape(Cin, 1).astype(jnp.float32)
        if h_tile is None:
            h_tile = _choose_h_tile(H, W, Cin, jnp.dtype(in_dtype).itemsize)
    elif bn_type == "ln":
        # LN statistics span the whole (Cin, H, W) slab -> full-sample blocks.
        # TODO(synk): cross-tile (Welford) stats would be needed to H-tile 'ln'.
        g = params["gamma"].reshape(Cin, H * W).astype(jnp.float32)
        b = params["beta"].reshape(Cin, H * W).astype(jnp.float32)
        h_tile = H
    else:
        raise ValueError(f"unknown bn_type: {bn_type}")

    assert H % h_tile == 0 and h_tile % 2 == 0
    Lt = h_tile * W
    Pt = (h_tile // 2) * (W // 2)
    P = (H // 2) * (W // 2)
    n_tiles = H // h_tile
    if n_tiles > 1:
        assert Lt % 128 == 0 and Pt % 128 == 0, "h_tile must give lane-aligned blocks"

    kernel = make_transition_kernel(bn_type, eps, h_tile, W)

    if bn_type == "bn":
        grid = (N, n_tiles)
        x_spec = pl.BlockSpec((1, Cin, Lt), lambda n, t: (n, 0, t))
        g_spec = pl.BlockSpec((Cin, 1), lambda n, t: (0, 0))
        b_spec = pl.BlockSpec((Cin, 1), lambda n, t: (0, 0))
        w_spec = pl.BlockSpec((Cout, Cin), lambda n, t: (0, 0))
        o_spec = pl.BlockSpec((1, Cout, Pt), lambda n, t: (n, 0, t))
        dims = ("parallel", "parallel")
    else:
        grid = (N,)
        x_spec = pl.BlockSpec((1, Cin, Lt), lambda n: (n, 0, 0))
        g_spec = pl.BlockSpec((Cin, H * W), lambda n: (0, 0))
        b_spec = pl.BlockSpec((Cin, H * W), lambda n: (0, 0))
        w_spec = pl.BlockSpec((Cout, Cin), lambda n: (0, 0))
        o_spec = pl.BlockSpec((1, Cout, P), lambda n: (n, 0, 0))
        dims = ("parallel",)

    out3 = pl.pallas_call(
        kernel,
        out_shape=jax.ShapeDtypeStruct((N, Cout, P), in_dtype),
        grid_spec=pltpu.PrefetchScalarGridSpec(
            num_scalar_prefetch=0,
            grid=grid,
            in_specs=[x_spec, g_spec, b_spec, w_spec],
            out_specs=o_spec),
        compiler_params=pltpu.CompilerParams(
            dimension_semantics=dims,
            vmem_limit_bytes=32 * 1024 * 1024),
    )(x3, g, b, w_k)

    return out3.reshape(N, Cout, H // 2, W // 2)         # free reshape back to NCHW


# ---------------------------------------------------------------------------
# Pure-JAX reference (NCHW, mirrors the PyTorch module) for correctness check.
# ---------------------------------------------------------------------------
def transition_reference(x, params, bn_type="bn", eps=1e-5):
    if bn_type == "bn":
        mean = params["running_mean"][None, :, None, None]
        var = params["running_var"][None, :, None, None]
        gamma = params["gamma"][None, :, None, None]
        beta = params["beta"][None, :, None, None]
        xn = (x - mean) / jnp.sqrt(var + eps) * gamma + beta
    else:
        mu = jnp.mean(x, axis=(1, 2, 3), keepdims=True)
        var = jnp.mean((x - mu) ** 2, axis=(1, 2, 3), keepdims=True)
        xn = (x - mu) / jnp.sqrt(var + eps) * params["gamma"][None] + params["beta"][None]
    a = jnp.maximum(xn, 0.0)
    y = jnp.einsum("nchw,oc->nohw", a, params["conv_w"])        # 1x1 conv, no bias
    N, Co, H, W = y.shape
    y = y.reshape(N, Co, H // 2, 2, W // 2, 2).mean(axis=(3, 5))  # avg_pool2d(2)
    return y


def _make_params(key, cin, cout, size):
    kw, kg, kb, km, kv, klg, klb = jax.random.split(key, 7)
    conv_w = jax.random.normal(kw, (cout, cin), dtype=jnp.float32) * 0.1
    p_bn = {
        "conv_w": conv_w,
        "gamma": 1.0 + 0.1 * jax.random.normal(kg, (cin,), dtype=jnp.float32),
        "beta": 0.1 * jax.random.normal(kb, (cin,), dtype=jnp.float32),
        "running_mean": 0.1 * jax.random.normal(km, (cin,), dtype=jnp.float32),
        "running_var": 1.0 + 0.1 * jax.random.uniform(kv, (cin,), dtype=jnp.float32),
    }
    p_ln = {
        "conv_w": conv_w,
        "gamma": 1.0 + 0.1 * jax.random.normal(klg, (cin, size, size), dtype=jnp.float32),
        "beta": 0.1 * jax.random.normal(klb, (cin, size, size), dtype=jnp.float32),
    }
    return p_bn, p_ln


if __name__ == "__main__":
    # TODO(synk): BatchNorm training-mode batch statistics are not implemented;
    # the 'bn' path uses inference-mode running statistics (the usual kernel setting).
    key = jax.random.PRNGKey(0)
    k1, k2, k3 = jax.random.split(key, 3)

    ok = True

    # Cases 1-2: module-sized shapes (in_planes=8, out_planes=4, size=16), bn + ln.
    N, Cin, Cout, S = 2, 8, 4, 16
    x = jax.random.normal(k1, (N, Cin, S, S), dtype=jnp.float32)
    p_bn, p_ln = _make_params(k2, Cin, Cout, S)
    for bn_type, params in (("bn", p_bn), ("ln", p_ln)):
        fwd = functools.partial(transition_forward, bn_type=bn_type)
        out = jax.block_until_ready(fwd(x, params))
        ref = transition_reference(x, params, bn_type=bn_type)
        assert out.shape == (N, Cout, S // 2, S // 2), out.shape
        err = float(jnp.max(jnp.abs(out - ref)))
        ok = ok and (err < 1e-4)

    # Case 3: bf16 activations (no wrapper upcast; bf16 operands on the MXU).
    x_bf16 = x.astype(jnp.bfloat16)
    out = jax.block_until_ready(transition_forward(x_bf16, p_bn, bn_type="bn"))
    ref = transition_reference(x_bf16.astype(jnp.float32), p_bn, bn_type="bn")
    err = float(jnp.max(jnp.abs(out.astype(jnp.float32) - ref)))
    ok = ok and (out.dtype == jnp.bfloat16) and (err < 3e-2)

    # Case 4: larger spatial extent with an explicit H-tile to exercise the
    #         spatially tiled grid path (grid = (N, H // h_tile) = (2, 2)).
    N2, Cin2, Cout2, S2 = 2, 16, 8, 32
    x2 = jax.random.normal(k3, (N2, Cin2, S2, S2), dtype=jnp.float32)
    p_bn2, _ = _make_params(jax.random.fold_in(k2, 1), Cin2, Cout2, S2)
    out = jax.block_until_ready(
        transition_forward(x2, p_bn2, bn_type="bn", h_tile=16))
    ref = transition_reference(x2, p_bn2, bn_type="bn")
    assert out.shape == (N2, Cout2, S2 // 2, S2 // 2), out.shape
    err = float(jnp.max(jnp.abs(out - ref)))
    ok = ok and (err < 1e-4)

    if ok:
        print("KERNEL_OK")
</pallas_src>

<mosaic_0001>
module attributes {stable_mosaic.version = 11 : i64} {
  func.func @kernel(%arg0: i32, %arg1: i32, %arg2: memref<1x8x256xf32, #tpu.memory_space<vmem>>, %arg3: memref<8x1xf32, #tpu.memory_space<vmem>>, %arg4: memref<8x1xf32, #tpu.memory_space<vmem>>, %arg5: memref<4x8xf32, #tpu.memory_space<vmem>>, %arg6: memref<1x4x64xf32, #tpu.memory_space<vmem>>) attributes {dimension_semantics = [#tpu.dimension_semantics<parallel>, #tpu.dimension_semantics<parallel>], iteration_bounds = array<i64: 2, 1>, scalar_prefetch = 0 : i64, scratch_operands = 0 : i64, tpu.core_type = #tpu.core_type<tc>, window_params = [{transform_indices = @transform_0, window_bounds = array<i64: 1, 8, 256>}, {pipeline_mode = #tpu.pipeline_mode<synchronous>, transform_indices = @transform_1, window_bounds = array<i64: 8, 1>}, {pipeline_mode = #tpu.pipeline_mode<synchronous>, transform_indices = @transform_2, window_bounds = array<i64: 8, 1>}, {pipeline_mode = #tpu.pipeline_mode<synchronous>, transform_indices = @transform_3, window_bounds = array<i64: 4, 8>}, {transform_indices = @transform_4, window_bounds = array<i64: 1, 4, 64>}]} {
    %c0 = arith.constant 0 : index
    %c0_0 = arith.constant 0 : index
    %c0_1 = arith.constant 0 : index
    %0 = vector.load %arg2[%c0, %c0_0, %c0_1] : memref<1x8x256xf32, #tpu.memory_space<vmem>>, vector<1x8x256xf32>
    %1 = vector.shape_cast %0 : vector<1x8x256xf32> to vector<8x256xf32>
    %c0_2 = arith.constant 0 : index
    %c0_3 = arith.constant 0 : index
    %2 = vector.load %arg3[%c0_2, %c0_3] : memref<8x1xf32, #tpu.memory_space<vmem>>, vector<8x1xf32>
    %3 = vector.broadcast %2 : vector<8x1xf32> to vector<8x256xf32>
    %4 = arith.mulf %1, %3 : vector<8x256xf32>
    %c0_4 = arith.constant 0 : index
    %c0_5 = arith.constant 0 : index
    %5 = vector.load %arg4[%c0_4, %c0_5] : memref<8x1xf32, #tpu.memory_space<vmem>>, vector<8x1xf32>
    %6 = vector.broadcast %5 : vector<8x1xf32> to vector<8x256xf32>
    %7 = arith.addf %4, %6 : vector<8x256xf32>
    %cst = arith.constant 0.000000e+00 : f32
    %8 = vector.broadcast %cst : f32 to vector<8x256xf32>
    %9 = arith.maximumf %7, %8 : vector<8x256xf32>
    %10 = tpu.transpose %9, [1, 0] : vector<8x256xf32> -> vector<256x8xf32>
    %11 = vector.shape_cast %10 : vector<256x8xf32> to vector<8x2x16x8xf32>
    %cst_6 = arith.constant dense<0.000000e+00> : vector<8x16x8xf32>
    %12 = vector.multi_reduction <add>, %11, %cst_6 [1] : vector<8x2x16x8xf32> to vector<8x16x8xf32>
    %13 = vector.shape_cast %12 : vector<8x16x8xf32> to vector<8x8x2x8xf32>
    %cst_7 = arith.constant dense<0.000000e+00> : vector<8x8x8xf32>
    %14 = vector.multi_reduction <add>, %13, %cst_7 [2] : vector<8x8x2x8xf32> to vector<8x8x8xf32>
    %15 = vector.shape_cast %14 : vector<8x8x8xf32> to vector<64x8xf32>
    %c0_8 = arith.constant 0 : index
    %c0_9 = arith.constant 0 : index
    %16 = vector.load %arg5[%c0_8, %c0_9] : memref<4x8xf32, #tpu.memory_space<vmem>>, vector<4x8xf32>
    %cst_10 = arith.constant dense<0.000000e+00> : vector<4x64xf32>
    %17 = tpu.matmul %16, %15, %cst_10 {dimension_numbers = #tpu.dot_dimension_numbers<[1], [1], [0], [0], [0, 0, 1, 0], [], []>} : vector<4x8xf32>, vector<64x8xf32>, vector<4x64xf32> -> vector<4x64xf32>
    %c0_11 = arith.constant 0 : index
    %c0_12 = arith.constant 0 : index
    %c0_13 = arith.constant 0 : index
    %18 = vector.load %arg6[%c0_11, %c0_12, %c0_13] : memref<1x4x64xf32, #tpu.memory_space<vmem>>, vector<1x4x64xf32>
    %19 = vector.shape_cast %18 : vector<1x4x64xf32> to vector<4x64xf32>
    %20 = vector.shape_cast %17 : vector<4x64xf32> to vector<1x4x64xf32>
    tpu.vector_store %arg6[%c0_11, %c0_12, %c0_13], %20 {strides = array<i32>} : memref<1x4x64xf32, #tpu.memory_space<vmem>>, vector<1x4x64xf32>,
    return
  }
  func.func @transform_0(%arg0: i32, %arg1: i32) -> (i32, i32, i32) {
    %c0_i32 = arith.constant 0 : i32
    %c0_i32_0 = arith.constant 0 : i32
    return %arg0, %c0_i32, %arg1 : i32, i32, i32
  }
  func.func @transform_1(%arg0: i32, %arg1: i32) -> (i32, i32) {
    %c0_i32 = arith.constant 0 : i32
    %c0_i32_0 = arith.constant 0 : i32
    %c0_i32_1 = arith.constant 0 : i32
    return %c0_i32, %c0_i32_0 : i32, i32
  }
  func.func @transform_2(%arg0: i32, %arg1: i32) -> (i32, i32) {
    %c0_i32 = arith.constant 0 : i32
    %c0_i32_0 = arith.constant 0 : i32
    %c0_i32_1 = arith.constant 0 : i32
    return %c0_i32, %c0_i32_0 : i32, i32
  }
  func.func @transform_3(%arg0: i32, %arg1: i32) -> (i32, i32) {
    %c0_i32 = arith.constant 0 : i32
    %c0_i32_0 = arith.constant 0 : i32
    %c0_i32_1 = arith.constant 0 : i32
    return %c0_i32, %c0_i32_0 : i32, i32
  }
  func.func @transform_4(%arg0: i32, %arg1: i32) -> (i32, i32, i32) {
    %c0_i32 = arith.constant 0 : i32
    %c0_i32_0 = arith.constant 0 : i32
    return %arg0, %c0_i32, %arg1 : i32, i32, i32
  }
}

</mosaic_0001>

<bundles_post_ra>
// kernel: tpu_custom_call.1
= control target key start
LH: loop header
LB: loop body
LE: loop exit
PB: predicated region body
PF: predicated region fallthrough
CT: control target
= control target key end

     0   :  { %9 = vsyncpa [#allocation3], 0  ;;  %s1729_s0 = inlined_call_operand.hbm [shape: f32[2,8,256], index: 0, kind: input, shape index: {}]   ;;  %s1730_s1 = inlined_call_operand.vmem [shape: f32[8,1], index: 1, kind: input, shape index: {}]   ;;  %s1731_s2 = inlined_call_operand.vmem [shape: f32[8,1], index: 2, kind: input, shape index: {}]   ;;  %s1732_s3 = inlined_call_operand.vmem [shape: f32[4,8], index: 3, kind: input, shape index: {}]   ;;  %s1733_s4 = inlined_call_operand.hbm [shape: f32[2,4,64], index: 4, kind: output, shape index: {}]  }
   0x1   :  { %11 = vsyncpa [#allocation3 + $0x1], 0 }
   0x2   :  { %12 = vsyncpa [#allocation4], 0 }
   0x3   :  { %14 = vsyncpa [#allocation4 + $0x1], 0  ;;  %s1426_s15 = smov 0   ;;  %s1428_s16 = smov 0  }
   0x4   :  { %s1430_s17 = smov 0   ;;  %s1432_s18 = smov 0  }
   0x5   :  { %s1434_s19 = smov 0   ;;  %s1436_s20 = smov 0  }
   0x6 LB: > { %s1197_s21 = sadd.s32 4294967295, %s1398_s20   ;;  %s1198_s22 = sadd.s32 4294967294, %s1398_s20   ;;  %s1398_s20 = sphi %s1436_s20, %s20_s20   ;;  %s1394_s19 = sphi %s1434_s19, %s1742_s19   ;;  %s1390_s18 = sphi %s1432_s18, %s1741_s18   ;;  %s1386_s17 = sphi %s1430_s17, %s1740_s17   ;;  %s1382_s16 = sphi %s1428_s16, %s1739_s16   ;;  %s1378_s15 = sphi %s1426_s15, %s1738_s15  }
   0x7   : > { %s32_s23 = sadd.s32 1, %s1394_s19  ;;  %s41_s24 = sadd.s32 1, %s1386_s17 }
   0x8   : > { %p34_p0 = scmp.ge.s32.totalorder %s32_s23, 2  ;;  %p48_p1 = scmp.ne.s32.totalorder %s1386_s17, %s1382_s16 }
   0x9   : > { %p49_p2 = scmp.eq.s32.totalorder %s1398_s20, 0  ;;  %p54_p3 = scmp.ne.s32.totalorder %s1382_s16, %s1378_s15 }
   0xa   : > { %s1744_s23 = smov (%p34_p0, %s32_s23), 0  ;;  %p55_p5 = scmp.eq.s32.totalorder %s1197_s21, 0 }
   0xb   : > { %p1467_p4 = por %p49_p2, %p48_p1  ;;  %s36_s26 = ssub.s32 %s1394_s19, %s1744_s23 }
   0xc   : > { %p143_p6 = scmp.eq.s32.totalorder %s1197_s21, 1  ;;  %p39_p7 = scmp.eq.s32.totalorder %s36_s26, 0 }
   0xd   : > { %p1473_p8 = por %p55_p5, %p54_p3  ;;  %p149_p10 = scmp.eq.s32.totalorder %s1198_s22, 1 }
   0xe   : > { %p1477_p9 = por %p143_p6, %p48_p1  ;;  %p1200_p12 = scmp.ge.s32.totalorder %s1398_s20, 2 }
   0xf   : > { %s1482_s29 = scalar_select %p39_p7, %s1386_s17, %s41_s24  }
  0x10   : > { %p1484_p11 = por %p149_p10, %p54_p3  ;;  %p1233_p13 = scmp.lt.s32.totalorder %s1398_s20, 2 }
  0x11   : > { %s178_s5 = sand.u32 1, %s1386_s17   ;;  %s1220_s7 = sshll.u32 %s1394_s19, 4 }
  0x12   : > { %s1201_s6 = sshll.u32 %s178_s5, 4  ;;  %s189_s10 = scalar_lea.hbm %s1729_s0, %s1220_s7 }
  0x13   : > { %s182_s11 = scalar_lea.vmem [#allocation2], %s1201_s6  ;;  %s191_s13 = sshll.u32 %s189_s10, 4  ;;  %s192_s13 = int_to_ptr.hbm [resolvable:$true] %s191_s13 }
  0x14   : > { %s193_s12 = sshll.u32 %s182_s11, 4  ;;  %p1226_p0 = pnand %p1233_p13, %p1467_p4  ;;  %s194_s12 = int_to_ptr.vmem [resolvable:$true] %s193_s12 }
  0x15   : > { %p1204_p1 = scmp.ge.s32.totalorder %s1398_s20, 1  ;;  %p198_p2 = scmp.lt.s32.totalorder %s1398_s20, 3 }
  0x16   : > { %s179_s14 = scalar_lea.sflag [#allocation3], %s178_s5 }
  0x17   : > { %1228 = dma.hbm_to_vmem [thread:$0]  (!%p1226_p0), %s192_s13, 256, %s194_s12, %s179_s14  }
  0x18   : > { %p199_p3 = pnand %p1204_p1, %p198_p2 }
  0x19   : > { %s1500_s21 = sand.u32 (!%p199_p3), 1, %s1382_s16  }
  0x1a   : > { %202 = sbr.rel (%p199_p3) target bundleno = 740 (0x2e4), region = 36  ;;  %s1205_s22 = sshll.u32 (!%p199_p3), %s1500_s21, 4 }
  0x1b   : > { %s205_s24 = scalar_lea.sflag (!%p199_p3), [#allocation3], %s1500_s21  ;;  %s208_s26 = scalar_lea.vmem (!%p199_p3), [#allocation2], %s1205_s22 }
  0x1f   : > { %1369 = dma.done.wait (%p1473_p8), %s205_s24, 256  }
  0x20   : > { %1371 = vsyncadd (%p1473_p8), %s205_s24, 4294967040  ;;  %v1400_v0 = vmov 0   ;;  %v237_v1 = vld [vmem:[%s1730_s1] sm:$0xff]  ;;  %v236_v5 = vld [vmem:[%s208_s26 + $0x8] sm:$0xff]  ;;  %vm319_vm0 = vcmask 64512   ;;  %vm480_vm1 = vcmask 58368  }
  0x21   : > { %1285 = vset.pattern.permute.xlu0 %v1400_v0  ;;  %v245_v2 = vld [vmem:[%s1731_s2] sm:$0xff]  ;;  %vm994_vm2 = vcmask 1041409   ;;  %vm996_vm3 = vcmask 1042434   ;;  %vm998_vm4 = vcmask 1043459   ;;  %vm1000_vm5 = vcmask 1044484   ;;  %s1206_s9 = sshll.u32 %s1500_s21, 2 }
  0x22   : > { %240 = vperm.xlu0 %1285, %v237_v1   ;;  %v235_v4 = vld [vmem:[%s208_s26] sm:$0xff]  ;;  %vm1002_vm6 = vcmask 1045509   ;;  %vm1004_vm7 = vcmask 1046534   ;;  %vm1006_vm8 = vcmask 1047559   ;;  %s1217_s10 = sshll.u32 %s1390_s18, 2  ;;  %s233_s14 = scalar_lea.vmem [#allocation5], %s1206_s9 }
  0x23   : > { %s1110_s13 = scalar_lea.hbm %s1733_s4, %s1217_s10  ;;  %s1112_s22 = sshll.u32 %s233_s14, 4  ;;  %vm1096_vm9 = vcmask 519168   ;;  %s1113_s22 = int_to_ptr.vmem [resolvable:$true] %s1112_s22 }
  0x24   : > { %s1114_s24 = sshll.u32 %s1110_s13, 4  ;;  %s1099_s26 = scalar_lea.sflag [#allocation4], %s1500_s21  ;;  %s1115_s24 = int_to_ptr.hbm [resolvable:$true] %s1114_s24 }
  0x25   : > { %s1330_s25 = sshra.s32 %s1115_s24, 4  ;;  %s1336_s7 = scalar_lea.hbm %s1733_s4, 8  ;;  %s1331_s25 = int_to_ptr.hbm [resolvable:$true] %s1330_s25 }
  0x26   : > { %s1332_s5 = scalar_lea.hbm %s1331_s25, 4  ;;  %p1337_p7 = scmp.lt.s32.totalorder %s1331_s25, %s1733_s4 }
  0x27   : > { %p1333_p4 = scmp.ne.s32.totalorder %s1331_s25, %s1332_s5  ;;  %p1338_p8 = scmp.lt.s32.totalorder %s1336_s7, %s1332_s5 }
  0x29   : > { %p1334_p5 = pnand %p1333_p4, %p1477_p9  ;;  %p1339_p10 = por %p1338_p8, %p1337_p7 }
  0x2a   : > { %248 = vperm.xlu0 %1285, %v245_v2  }
  0x2b   : > { %p1335_p6 = pneg %p1334_p5 }
  0x2d   : > { %p1340_p13 = pnand %p1339_p10, %p1335_p6 }
  0x94   : > { %v241_v3 = vpop.permute.xlu0 %240 }
  0x95   : > { %v243_v6 = vmul.f32 %v241_v3, %v235_v4  ;;  %v244_v7 = vmul.f32 %v241_v3, %v236_v5 }
  0x9c   : > { %v249_v8 = vpop.permute.xlu0 %248 }
  0x9d   : > { %v251_v9 = vadd.f32 %v249_v8, %v243_v6  ;;  %v252_v10 = vadd.f32 %v249_v8, %v244_v7 }
  0x9f   : > { %v254_v11 = vmax.f32 %v252_v10, 0.0  ;;  %v253_v12 = vmax.f32 %v251_v9, 0.0 }
  0xa1   : > { %287 = vxpose.xlu1.b32.start.end [1/1] (short) %v254_v11, 128 }
 0x121   : > { %255 = vxpose.xlu1.b32.start.end [1/1] (short) %v253_v12, 128 }
 0x145   : > { %v303_v13 = vpop.trf.xlu1 }
 0x146   : > { %v344_v16 = vsel %vm319_vm0, %v303_v13, 0.0 }
 0x14d   : > { %v304_v14 = vpop.trf.xlu1 }
 0x14e   : > { %v347_v37 = vsel %vm319_vm0, %v304_v14, 0.0 }
 0x155   : > { %v305_v15 = vpop.trf.xlu1 }
 0x156   : > { %v345_v17 = vsel %vm319_vm0, %v305_v15, 0.0 }
 0x157   : > { %v346_v18 = vadd.f32 %v345_v17, %v344_v16 }
 0x159   : > { %v408_v19 = vrot.slane %v346_v18, 2  ;;  %v409_v20 = vrot.slane %v346_v18, 4  ;;  %v410_v21 = vrot.slane %v346_v18, 6  ;;  %v705_v22 = vsel %vm480_vm1, %v346_v18, 0.0 }
 0x15a   : > { %v706_v23 = vrot.slane %v705_v22, 4 }
 0x15b   : > { %v712_v24 = vsel %vm480_vm1, %v408_v19, 0.0  ;;  %v719_v25 = vsel %vm480_vm1, %v409_v20, 0.0  ;;  %v726_v26 = vsel %vm480_vm1, %v410_v21, 0.0 }
 0x15c   : > { %v707_v27 = vadd.f32 %v706_v23, %v705_v22  ;;  %v713_v28 = vrot.slane %v712_v24, 4  ;;  %v720_v29 = vrot.slane %v719_v25, 4  ;;  %v727_v30 = vrot.slane %v726_v26, 4 }
 0x15d   : > { %v306_v31 = vpop.trf.xlu1 }
 0x15e   : > { %v708_v32 = vrot.slane %v707_v27, 2  ;;  %v714_v33 = vadd.f32 %v713_v28, %v712_v24  ;;  %v721_v34 = vadd.f32 %v720_v29, %v719_v25  ;;  %v728_v35 = vadd.f32 %v727_v30, %v726_v26 }
 0x15f   : > { %v348_v36 = vsel %vm319_vm0, %v306_v31, 0.0 }
 0x160   : > { %v709_v38 = vadd.f32 %v708_v32, %v707_v27  ;;  %v715_v39 = vrot.slane %v714_v33, 2  ;;  %v722_v40 = vrot.slane %v721_v34, 2  ;;  %v349_v41 = vadd.f32 %v348_v36, %v347_v37 }
 0x161   : > { %v729_v44 = vrot.slane %v728_v35, 2 }
 0x162   : > { %v716_v42 = vadd.f32 %v715_v39, %v714_v33  ;;  %v723_v43 = vadd.f32 %v722_v40, %v721_v34  ;;  %v411_v45 = vrot.slane %v349_v41, 2  ;;  %v412_v46 = vrot.slane %v349_v41, 4 }
 0x163   : > { %v413_v47 = vrot.slane %v349_v41, 6  ;;  %v733_v48 = vsel %vm480_vm1, %v349_v41, 0.0  ;;  %v710_v49 = vrot.slane %v709_v38, 1  ;;  %v730_v58 = vadd.f32 %v729_v44, %v728_v35 }
 0x164   : > { %v717_v50 = vrot.slane %v716_v42, 1  ;;  %v724_v51 = vrot.slane %v723_v43, 1  ;;  %v734_v52 = vrot.slane %v733_v48, 4  ;;  %v740_v53 = vsel %vm480_vm1, %v411_v45, 0.0 }
 0x165   : > { %v747_v54 = vsel %vm480_vm1, %v412_v46, 0.0  ;;  %v307_v55 = vpop.trf.xlu1  ;;  %v754_v56 = vsel %vm480_vm1, %v413_v47, 0.0  ;;  %v741_v59 = vrot.slane %v740_v53, 4  ;;  %v711_v63 = vadd.f32 %v710_v49, %v709_v38 }
 0x166   : > { %v718_v57 = vadd.f32 %v717_v50, %v716_v42  ;;  %v748_v60 = vrot.slane %v747_v54, 4  ;;  %v735_v61 = vadd.f32 %v734_v52, %v733_v48  ;;  %v755_v62 = vrot.slane %v754_v56, 4 }
 0x167   : > { %v742_v0 = vadd.f32 %v741_v59, %v740_v53  ;;  %v725_v2 = vadd.f32 %v724_v51, %v723_v43  ;;  %v731_v5 = vrot.slane %v730_v58, 1  ;;  %v350_v31 = vsel %vm319_vm0, %v307_v55, 0.0 }
 0x168   : > { %v749_v1 = vadd.f32 %v748_v60, %v747_v54  ;;  %v736_v3 = vrot.slane %v735_v61, 2  ;;  %v756_v4 = vadd.f32 %v755_v62, %v754_v56  ;;  %v1029_v8 = vsel %vm994_vm2, %v718_v57, %v711_v63 }
 0x169   : > { %v743_v6 = vrot.slane %v742_v0, 2  ;;  %v1030_v16 = vsel %vm996_vm3, %v725_v2, %v1029_v8  ;;  %v732_v17 = vadd.f32 %v731_v5, %v730_v58 }
 0x16a   : > { %v750_v7 = vrot.slane %v749_v1, 2  ;;  %v737_v9 = vadd.f32 %v736_v3, %v735_v61  ;;  %v757_v10 = vrot.slane %v756_v4, 2 }
 0x16b   : > { %v744_v11 = vadd.f32 %v743_v6, %v742_v0  ;;  %v1031_v24 = vsel %vm998_vm4, %v732_v17, %v1030_v16 }
 0x16c   : > { %v751_v12 = vadd.f32 %v750_v7, %v749_v1  ;;  %v738_v13 = vrot.slane %v737_v9, 1  ;;  %v758_v15 = vadd.f32 %v757_v10, %v756_v4 }
 0x16d   : > { %v308_v14 = vpop.trf.xlu1  ;;  %v745_v18 = vrot.slane %v744_v11, 1 }
 0x16e   : > { %v752_v19 = vrot.slane %v751_v12, 1  ;;  %v739_v20 = vadd.f32 %v738_v13, %v737_v9  ;;  %v759_v21 = vrot.slane %v758_v15, 1  ;;  %v353_v52 = vsel %vm319_vm0, %v308_v14, 0.0 }
 0x16f   : > { %v746_v22 = vadd.f32 %v745_v18, %v744_v11 }
 0x170   : > { %v753_v23 = vadd.f32 %v752_v19, %v751_v12  ;;  %v1032_v25 = vsel %vm1000_vm5, %v739_v20, %v1031_v24  ;;  %v760_v26 = vadd.f32 %v759_v21, %v758_v15 }
 0x171   : > { %v1033_v27 = vsel %vm1002_vm6, %v746_v22, %v1032_v25 }
 0x172   : > { %v1034_v28 = vsel %vm1004_vm7, %v753_v23, %v1033_v27 }
 0x173   : > { %v1533_v29 = vsel %vm1006_vm8, %v760_v26, %v1034_v28 }
 0x175   : > { %v309_v30 = vpop.trf.xlu1 }
 0x176   : > { %v351_v32 = vsel %vm319_vm0, %v309_v30, 0.0 }
 0x177   : > { %v352_v33 = vadd.f32 %v351_v32, %v350_v31 }
 0x179   : > { %v414_v34 = vrot.slane %v352_v33, 2  ;;  %v415_v35 = vrot.slane %v352_v33, 4  ;;  %v416_v36 = vrot.slane %v352_v33, 6  ;;  %v761_v37 = vsel %vm480_vm1, %v352_v33, 0.0 }
 0x17a   : > { %v762_v38 = vrot.slane %v761_v37, 4 }
 0x17b   : > { %v768_v39 = vsel %vm480_vm1, %v414_v34, 0.0  ;;  %v775_v40 = vsel %vm480_vm1, %v415_v35, 0.0  ;;  %v782_v41 = vsel %vm480_vm1, %v416_v36, 0.0 }
 0x17c   : > { %v763_v42 = vadd.f32 %v762_v38, %v761_v37  ;;  %v769_v43 = vrot.slane %v768_v39, 4  ;;  %v776_v44 = vrot.slane %v775_v40, 4  ;;  %v783_v45 = vrot.slane %v782_v41, 4 }
 0x17d   : > { %v310_v46 = vpop.trf.xlu1 }
 0x17e   : > { %v764_v47 = vrot.slane %v763_v42, 2  ;;  %v770_v48 = vadd.f32 %v769_v43, %v768_v39  ;;  %v777_v49 = vadd.f32 %v776_v44, %v775_v40  ;;  %v784_v50 = vadd.f32 %v783_v45, %v782_v41 }
 0x17f   : > { %v354_v51 = vsel %vm319_vm0, %v310_v46, 0.0 }
 0x180   : > { %v765_v53 = vadd.f32 %v764_v47, %v763_v42  ;;  %v771_v54 = vrot.slane %v770_v48, 2  ;;  %v778_v55 = vrot.slane %v777_v49, 2  ;;  %v355_v56 = vadd.f32 %v354_v51, %v353_v52 }
 0x181   : > { %v785_v59 = vrot.slane %v784_v50, 2 }
 0x182   : > { %v772_v57 = vadd.f32 %v771_v54, %v770_v48  ;;  %v779_v58 = vadd.f32 %v778_v55, %v777_v49  ;;  %v417_v60 = vrot.slane %v355_v56, 2  ;;  %v418_v61 = vrot.slane %v355_v56, 4 }
 0x183   : > { %v419_v62 = vrot.slane %v355_v56, 6  ;;  %v789_v63 = vsel %vm480_vm1, %v355_v56, 0.0  ;;  %v766_v0 = vrot.slane %v765_v53, 1  ;;  %v786_v9 = vadd.f32 %v785_v59, %v784_v50 }
 0x184   : > { %v773_v1 = vrot.slane %v772_v57, 1  ;;  %v780_v2 = vrot.slane %v779_v58, 1  ;;  %v790_v3 = vrot.slane %v789_v63, 4  ;;  %v796_v4 = vsel %vm480_vm1, %v417_v60, 0.0 }
 0x185   : > { %v803_v5 = vsel %vm480_vm1, %v418_v61, 0.0  ;;  %v311_v6 = vpop.trf.xlu1  ;;  %v810_v7 = vsel %vm480_vm1, %v419_v62, 0.0  ;;  %v797_v10 = vrot.slane %v796_v4, 4  ;;  %v767_v14 = vadd.f32 %v766_v0, %v765_v53 }
 0x186   : > { %v774_v8 = vadd.f32 %v773_v1, %v772_v57  ;;  %v804_v11 = vrot.slane %v803_v5, 4  ;;  %v791_v12 = vadd.f32 %v790_v3, %v789_v63  ;;  %v811_v13 = vrot.slane %v810_v7, 4 }
 0x187   : > { %v798_v15 = vadd.f32 %v797_v10, %v796_v4  ;;  %v781_v17 = vadd.f32 %v780_v2, %v779_v58  ;;  %v787_v20 = vrot.slane %v786_v9, 1  ;;  %v356_v48 = vsel %vm319_vm0, %v311_v6, 0.0 }
 0x188   : > { %v805_v16 = vadd.f32 %v804_v11, %v803_v5  ;;  %v792_v18 = vrot.slane %v791_v12, 2  ;;  %v812_v19 = vadd.f32 %v811_v13, %v810_v7  ;;  %v1036_v23 = vsel %vm994_vm2, %v774_v8, %v767_v14 }
 0x189   : > { %v799_v21 = vrot.slane %v798_v15, 2  ;;  %v1037_v32 = vsel %vm996_vm3, %v781_v17, %v1036_v23  ;;  %v788_v33 = vadd.f32 %v787_v20, %v786_v9 }
 0x18a   : > { %v806_v22 = vrot.slane %v805_v16, 2  ;;  %v793_v24 = vadd.f32 %v792_v18, %v791_v12  ;;  %v813_v25 = vrot.slane %v812_v19, 2 }
 0x18b   : > { %v800_v26 = vadd.f32 %v799_v21, %v798_v15  ;;  %v1038_v40 = vsel %vm998_vm4, %v788_v33, %v1037_v32 }
 0x18c   : > { %v807_v27 = vadd.f32 %v806_v22, %v805_v16  ;;  %v794_v28 = vrot.slane %v793_v24, 1  ;;  %v814_v31 = vadd.f32 %v813_v25, %v812_v19 }
 0x18d   : > { %v312_v30 = vpop.trf.xlu1  ;;  %v801_v34 = vrot.slane %v800_v26, 1 }
 0x18e   : > { %v808_v35 = vrot.slane %v807_v27, 1  ;;  %v795_v36 = vadd.f32 %v794_v28, %v793_v24  ;;  %v815_v37 = vrot.slane %v814_v31, 1  ;;  %v359_v2 = vsel %vm319_vm0, %v312_v30, 0.0 }
 0x18f   : > { %v802_v38 = vadd.f32 %v801_v34, %v800_v26 }
 0x190   : > { %v809_v39 = vadd.f32 %v808_v35, %v807_v27  ;;  %v1039_v41 = vsel %vm1000_vm5, %v795_v36, %v1038_v40  ;;  %v816_v42 = vadd.f32 %v815_v37, %v814_v31 }
 0x191   : > { %v1040_v43 = vsel %vm1002_vm6, %v802_v38, %v1039_v41 }
 0x192   : > { %v1041_v44 = vsel %vm1004_vm7, %v809_v39, %v1040_v43 }
 0x193   : > { %v1554_v45 = vsel %vm1006_vm8, %v816_v42, %v1041_v44 }
 0x195   : > { %v313_v46 = vpop.trf.xlu1 }
 0x196   : > { %v357_v47 = vsel %vm319_vm0, %v313_v46, 0.0 }
 0x197   : > { %v358_v49 = vadd.f32 %v357_v47, %v356_v48 }
 0x199   : > { %v420_v50 = vrot.slane %v358_v49, 2  ;;  %v421_v52 = vrot.slane %v358_v49, 4  ;;  %v422_v54 = vrot.slane %v358_v49, 6  ;;  %v817_v55 = vsel %vm480_vm1, %v358_v49, 0.0 }
 0x19a   : > { %v818_v59 = vrot.slane %v817_v55, 4 }
 0x19b   : > { %v824_v53 = vsel %vm480_vm1, %v420_v50, 0.0  ;;  %v831_v57 = vsel %vm480_vm1, %v421_v52, 0.0  ;;  %v838_v60 = vsel %vm480_vm1, %v422_v54, 0.0 }
 0x19c   : > { %v825_v56 = vrot.slane %v824_v53, 4  ;;  %v832_v62 = vrot.slane %v831_v57, 4  ;;  %v819_v0 = vadd.f32 %v818_v59, %v817_v55  ;;  %v839_v1 = vrot.slane %v838_v60, 4 }
 0x19d   : > { %v314_v51 = vpop.trf.xlu1 }
 0x19e   : > { %v826_v61 = vadd.f32 %v825_v56, %v824_v53  ;;  %v360_v63 = vsel %vm319_vm0, %v314_v51, 0.0  ;;  %v833_v4 = vadd.f32 %v832_v62, %v831_v57  ;;  %v820_v7 = vrot.slane %v819_v0, 2 }
 0x19f   : > { %v361_v5 = vadd.f32 %v360_v63, %v359_v2  ;;  %v840_v8 = vadd.f32 %v839_v1, %v838_v60 }
 0x1a0   : > { %v827_v3 = vrot.slane %v826_v61, 2  ;;  %v834_v10 = vrot.slane %v833_v4, 2  ;;  %v821_v14 = vadd.f32 %v820_v7, %v819_v0 }
 0x1a1   : > { %v423_v11 = vrot.slane %v361_v5, 2  ;;  %v424_v12 = vrot.slane %v361_v5, 4  ;;  %v845_v13 = vsel %vm480_vm1, %v361_v5, 0.0  ;;  %v841_v15 = vrot.slane %v840_v8, 2 }
 0x1a2   : > { %v828_v9 = vadd.f32 %v827_v3, %v826_v61  ;;  %v425_v16 = vrot.slane %v361_v5, 6  ;;  %v835_v18 = vadd.f32 %v834_v10, %v833_v4  ;;  %v846_v19 = vrot.slane %v845_v13, 4 }
 0x1a3   : > { %v852_v20 = vsel %vm480_vm1, %v423_v11, 0.0  ;;  %v859_v21 = vsel %vm480_vm1, %v424_v12, 0.0  ;;  %v822_v23 = vrot.slane %v821_v14, 1  ;;  %v842_v24 = vadd.f32 %v841_v15, %v840_v8 }
 0x1a4   : > { %v829_v17 = vrot.slane %v828_v9, 1  ;;  %v853_v27 = vrot.slane %v852_v20, 4  ;;  %v866_v30 = vsel %vm480_vm1, %v425_v16, 0.0  ;;  %v836_v32 = vrot.slane %v835_v18, 1 }
 0x1a5   : > { %v315_v58 = vpop.trf.xlu1  ;;  %v847_v33 = vadd.f32 %v846_v19, %v845_v13  ;;  %v860_v34 = vrot.slane %v859_v21, 4  ;;  %v823_v39 = vadd.f32 %v822_v23, %v821_v14  ;;  %v843_v40 = vrot.slane %v842_v24, 1 }
 0x1a6   : > { %v362_v25 = vsel %vm319_vm0, %v315_v58, 0.0  ;;  %v830_v31 = vadd.f32 %v829_v17, %v828_v9  ;;  %v867_v42 = vrot.slane %v866_v30, 4  ;;  %v854_v43 = vadd.f32 %v853_v27, %v852_v20 }
 0x1a7   : > { %v837_v52 = vadd.f32 %v836_v32, %v835_v18  ;;  %v848_v53 = vrot.slane %v847_v33, 2  ;;  %v861_v55 = vadd.f32 %v860_v34, %v859_v21  ;;  %v844_v63 = vadd.f32 %v843_v40, %v842_v24 }
 0x1a8   : > { %v1043_v56 = vsel %vm994_vm2, %v830_v31, %v823_v39  ;;  %v855_v61 = vrot.slane %v854_v43, 2  ;;  %v868_v0 = vadd.f32 %v867_v42, %v866_v30 }
 0x1a9   : > { %v862_v8 = vrot.slane %v861_v55, 2  ;;  %v1044_v9 = vsel %vm996_vm3, %v837_v52, %v1043_v56  ;;  %v849_v10 = vadd.f32 %v848_v53, %v847_v33 }
 0x1aa   : > { %v856_v20 = vadd.f32 %v855_v61, %v854_v43  ;;  %v869_v34 = vrot.slane %v868_v0, 2 }
 0x1ab   : > { %v850_v31 = vrot.slane %v849_v10, 1  ;;  %v863_v42 = vadd.f32 %v862_v8, %v861_v55 }
 0x1ad   : > { %v316_v6 = vpop.trf.xlu1 }
 0x1ae   : > { %v365_v1 = vsel %vm319_vm0, %v316_v6, 0.0 }
 0x1b5   : > { %v317_v22 = vpop.trf.xlu1 }
 0x1b6   : > { %v363_v26 = vsel %vm319_vm0, %v317_v22, 0.0 }
 0x1b7   : > { %v364_v28 = vadd.f32 %v363_v26, %v362_v25 }
 0x1b9   : > { %v426_v35 = vrot.slane %v364_v28, 2  ;;  %v427_v36 = vrot.slane %v364_v28, 4  ;;  %v428_v37 = vrot.slane %v364_v28, 6  ;;  %v873_v38 = vsel %vm480_vm1, %v364_v28, 0.0 }
 0x1ba   : > { %v874_v41 = vrot.slane %v873_v38, 4 }
 0x1bb   : > { %v880_v44 = vsel %vm480_vm1, %v426_v35, 0.0  ;;  %v887_v46 = vsel %vm480_vm1, %v427_v36, 0.0  ;;  %v894_v47 = vsel %vm480_vm1, %v428_v37, 0.0 }
 0x1bc   : > { %v875_v48 = vadd.f32 %v874_v41, %v873_v38  ;;  %v881_v49 = vrot.slane %v880_v44, 4  ;;  %v888_v50 = vrot.slane %v887_v46, 4  ;;  %v895_v51 = vrot.slane %v894_v47, 4 }
 0x1bd   : > { %v318_v54 = vpop.trf.xlu1 }
 0x1be   : > { %v876_v57 = vrot.slane %v875_v48, 2  ;;  %v882_v58 = vadd.f32 %v881_v49, %v880_v44  ;;  %v889_v59 = vadd.f32 %v888_v50, %v887_v46  ;;  %v896_v60 = vadd.f32 %v895_v51, %v894_v47 }
 0x1bf   : > { %v366_v62 = vsel %vm319_vm0, %v318_v54, 0.0  ;;  %v857_v47 = vrot.slane %v856_v20, 1  ;;  %v851_v49 = vadd.f32 %v850_v31, %v849_v10  ;;  %v1045_v50 = vsel %vm998_vm4, %v844_v63, %v1044_v9 }
 0x1c0   : > { %v877_v2 = vadd.f32 %v876_v57, %v875_v48  ;;  %v883_v3 = vrot.slane %v882_v58, 2  ;;  %v890_v4 = vrot.slane %v889_v59, 2  ;;  %v897_v5 = vrot.slane %v896_v60, 2 }
 0x1c1   : > { %v367_v7 = vadd.f32 %v366_v62, %v365_v1  ;;  %v858_v1 = vadd.f32 %v857_v47, %v856_v20 }
 0x1c2   : > { %v878_v11 = vrot.slane %v877_v2, 1  ;;  %v884_v12 = vadd.f32 %v883_v3, %v882_v58  ;;  %v891_v13 = vadd.f32 %v890_v4, %v889_v59  ;;  %v898_v21 = vadd.f32 %v897_v5, %v896_v60 }
 0x1c3   : > { %v429_v14 = vrot.slane %v367_v7, 2  ;;  %v430_v15 = vrot.slane %v367_v7, 4  ;;  %v431_v16 = vrot.slane %v367_v7, 6  ;;  %v901_v17 = vsel %vm480_vm1, %v367_v7, 0.0 }
 0x1c4   : > { %v885_v18 = vrot.slane %v884_v12, 1  ;;  %v892_v19 = vrot.slane %v891_v13, 1  ;;  %v902_v6 = vrot.slane %v901_v17, 4  ;;  %v879_v32 = vadd.f32 %v878_v11, %v877_v2 }
 0x1c5   : > { %v908_v22 = vsel %vm480_vm1, %v429_v14, 0.0  ;;  %v915_v23 = vsel %vm480_vm1, %v430_v15, 0.0  ;;  %v271_v24 = vpop.trf.xlu1  ;;  %v922_v25 = vsel %vm480_vm1, %v431_v16, 0.0  ;;  %v899_v39 = vrot.slane %v898_v21, 1 }
 0x1c6   : > { %v886_v26 = vadd.f32 %v885_v18, %v884_v12  ;;  %v903_v27 = vadd.f32 %v902_v6, %v901_v17  ;;  %v909_v28 = vrot.slane %v908_v22, 4  ;;  %v916_v30 = vrot.slane %v915_v23, 4 }
 0x1c7   : > { %v923_v33 = vrot.slane %v922_v25, 4  ;;  %v893_v37 = vadd.f32 %v892_v19, %v891_v13  ;;  %v900_v57 = vadd.f32 %v899_v39, %v898_v21  ;;  %v864_v59 = vrot.slane %v863_v42, 1 }
 0x1c8   : > { %v904_v35 = vrot.slane %v903_v27, 2  ;;  %v910_v36 = vadd.f32 %v909_v28, %v908_v22  ;;  %v917_v38 = vadd.f32 %v916_v30, %v915_v23  ;;  %v1050_v41 = vsel %vm994_vm2, %v886_v26, %v879_v32 }
 0x1c9   : > { %v924_v40 = vadd.f32 %v923_v33, %v922_v25  ;;  %v1051_v54 = vsel %vm996_vm3, %v893_v37, %v1050_v41  ;;  %v870_v60 = vadd.f32 %v869_v34, %v868_v0  ;;  %v1046_v4 = vsel %vm1000_vm5, %v851_v49, %v1045_v50 }
 0x1ca   : > { %v905_v43 = vadd.f32 %v904_v35, %v903_v27  ;;  %v911_v44 = vrot.slane %v910_v36, 2  ;;  %v918_v46 = vrot.slane %v917_v38, 2  ;;  %v1052_v3 = vsel %vm998_vm4, %v900_v57, %v1051_v54 }
 0x1cb   : > { %v925_v48 = vrot.slane %v924_v40, 2  ;;  %v865_v8 = vadd.f32 %v864_v59, %v863_v42  ;;  %v871_v11 = vrot.slane %v870_v60, 1  ;;  %v1047_v0 = vsel %vm1002_vm6, %v858_v1, %v1046_v4 }
 0x1cc   : > { %v906_v51 = vrot.slane %v905_v43, 1  ;;  %v912_v52 = vadd.f32 %v911_v44, %v910_v36  ;;  %v919_v53 = vadd.f32 %v918_v46, %v917_v38  ;;  %v320_v16 = vsel %vm319_vm0, %v271_v24, 0.0 }
 0x1cd   : > { %v272_v56 = vpop.trf.xlu1  ;;  %v926_v58 = vadd.f32 %v925_v48, %v924_v40  ;;  %v1048_v15 = vsel %vm1004_vm7, %v865_v8, %v1047_v0  ;;  %v872_v18 = vadd.f32 %v871_v11, %v870_v60 }
 0x1ce   : > { %v907_v61 = vadd.f32 %v906_v51, %v905_v43  ;;  %v913_v55 = vrot.slane %v912_v52, 1  ;;  %v920_v62 = vrot.slane %v919_v53, 1  ;;  %v323_v39 = vsel %vm319_vm0, %v272_v56, 0.0 }
 0x1cf   : > { %v927_v2 = vrot.slane %v926_v58, 1  ;;  %v1049_v6 = vsel %vm1006_vm8, %v872_v18, %v1048_v15 }
 0x1d0   : > { %v914_v63 = vadd.f32 %v913_v55, %v912_v52  ;;  %v921_v5 = vadd.f32 %v920_v62, %v919_v53  ;;  %v1053_v7 = vsel %vm1000_vm5, %v907_v61, %v1052_v3 }
 0x1d1   : > { %v928_v9 = vadd.f32 %v927_v2, %v926_v58 }
 0x1d2   : > { %v1054_v10 = vsel %vm1002_vm6, %v914_v63, %v1053_v7 }
 0x1d3   : > { %v1055_v12 = vsel %vm1004_vm7, %v921_v5, %v1054_v10 }
 0x1d4   : > { %v1056_v13 = vsel %vm1006_vm8, %v928_v9, %v1055_v12 }
 0x1d5   : > { %1207 = vmatpush.xpose.msk.msra.mxu0 %vm319_vm0, %v1056_v13  ;;  %v273_v14 = vpop.trf.xlu1 }
 0x1d6   : > { %v321_v17 = vsel %vm319_vm0, %v273_v14, 0.0 }
 0x1d7   : > { %v322_v19 = vadd.f32 %v321_v17, %v320_v16 }
 0x1d9   : > { %v384_v20 = vrot.slane %v322_v19, 2  ;;  %v385_v21 = vrot.slane %v322_v19, 4  ;;  %v386_v22 = vrot.slane %v322_v19, 6  ;;  %v481_v23 = vsel %vm480_vm1, %v322_v19, 0.0  ;;  %1208 = vmatpush.xpose.msk.msra.mxu0 %vm319_vm0, %v1049_v6 }
 0x1da   : > { %v482_v25 = vrot.slane %v481_v23, 4 }
 0x1db   : > { %v488_v26 = vsel %vm480_vm1, %v384_v20, 0.0  ;;  %v495_v27 = vsel %vm480_vm1, %v385_v21, 0.0  ;;  %v502_v24 = vsel %vm480_vm1, %v386_v22, 0.0 }
 0x1dc   : > { %v483_v28 = vadd.f32 %v482_v25, %v481_v23  ;;  %v489_v30 = vrot.slane %v488_v26, 4  ;;  %v496_v31 = vrot.slane %v495_v27, 4  ;;  %v503_v32 = vrot.slane %v502_v24, 4 }
 0x1dd   : > { %1209 = vmatpush.xpose.msk.msra.mxu0 %vm319_vm0, %v1554_v45  ;;  %v274_v33 = vpop.trf.xlu1 }
 0x1de   : > { %v484_v34 = vrot.slane %v483_v28, 2  ;;  %v490_v35 = vadd.f32 %v489_v30, %v488_v26  ;;  %v497_v36 = vadd.f32 %v496_v31, %v495_v27  ;;  %v504_v37 = vadd.f32 %v503_v32, %v502_v24 }
 0x1df   : > { %v324_v38 = vsel %vm319_vm0, %v274_v33, 0.0 }
 0x1e0   : > { %v485_v40 = vadd.f32 %v484_v34, %v483_v28  ;;  %v491_v41 = vrot.slane %v490_v35, 2  ;;  %v498_v42 = vrot.slane %v497_v36, 2  ;;  %v325_v43 = vadd.f32 %v324_v38, %v323_v39 }
 0x1e1   : > { %1210 = vmatpush.xpose.msk.msra.mxu0 %vm319_vm0, %v1533_v29  ;;  %v505_v47 = vrot.slane %v504_v37, 2 }
 0x1e2   : > { %v492_v44 = vadd.f32 %v491_v41, %v490_v35  ;;  %v499_v46 = vadd.f32 %v498_v42, %v497_v36  ;;  %v387_v45 = vrot.slane %v325_v43, 2  ;;  %v388_v48 = vrot.slane %v325_v43, 4 }
 0x1e3   : > { %v389_v49 = vrot.slane %v325_v43, 6  ;;  %v509_v50 = vsel %vm480_vm1, %v325_v43, 0.0  ;;  %v486_v51 = vrot.slane %v485_v40, 1  ;;  %v506_v60 = vadd.f32 %v505_v47, %v504_v37 }
 0x1e4   : > { %v493_v52 = vrot.slane %v492_v44, 1  ;;  %v500_v53 = vrot.slane %v499_v46, 1  ;;  %v510_v54 = vrot.slane %v509_v50, 4  ;;  %v516_v56 = vsel %vm480_vm1, %v387_v45, 0.0 }
 0x1e5   : > { %v523_v57 = vsel %vm480_vm1, %v388_v48, 0.0  ;;  %v275_v58 = vpop.trf.xlu1  ;;  %v530_v59 = vsel %vm480_vm1, %v389_v49, 0.0  ;;  %v517_v61 = vrot.slane %v516_v56, 4  ;;  %v487_v2 = vadd.f32 %v486_v51, %v485_v40 }
 0x1e6   : > { %v494_v29 = vadd.f32 %v493_v52, %v492_v44  ;;  %v524_v55 = vrot.slane %v523_v57, 4  ;;  %v511_v62 = vadd.f32 %v510_v54, %v509_v50  ;;  %v531_v1 = vrot.slane %v530_v59, 4 }
 0x1e7   : > { %v518_v3 = vadd.f32 %v517_v61, %v516_v56  ;;  %v501_v63 = vadd.f32 %v500_v53, %v499_v46  ;;  %v507_v8 = vrot.slane %v506_v60, 1  ;;  %v326_v33 = vsel %vm319_vm0, %v275_v58, 0.0 }
 0x1e8   : > { %v525_v4 = vadd.f32 %v524_v55, %v523_v57  ;;  %v512_v5 = vrot.slane %v511_v62, 2  ;;  %v532_v7 = vadd.f32 %v531_v1, %v530_v59  ;;  %v995_v11 = vsel %vm994_vm2, %v494_v29, %v487_v2 }
 0x1e9   : > { %v519_v9 = vrot.slane %v518_v3, 2  ;;  %v997_v18 = vsel %vm996_vm3, %v501_v63, %v995_v11  ;;  %v508_v19 = vadd.f32 %v507_v8, %v506_v60 }
 0x1ea   : > { %v526_v10 = vrot.slane %v525_v4, 2  ;;  %v513_v0 = vadd.f32 %v512_v5, %v511_v62  ;;  %v533_v12 = vrot.slane %v532_v7, 2 }
 0x1eb   : > { %v520_v13 = vadd.f32 %v519_v9, %v518_v3  ;;  %v999_v26 = vsel %vm998_vm4, %v508_v19, %v997_v18 }
 0x1ec   : > { %v527_v14 = vadd.f32 %v526_v10, %v525_v4  ;;  %v514_v15 = vrot.slane %v513_v0, 1  ;;  %v534_v17 = vadd.f32 %v533_v12, %v532_v7 }
 0x1ed   : > { %v276_v16 = vpop.trf.xlu1  ;;  %v521_v6 = vrot.slane %v520_v13, 1 }
 0x1ee   : > { %v528_v20 = vrot.slane %v527_v14, 1  ;;  %v515_v21 = vadd.f32 %v514_v15, %v513_v0  ;;  %v535_v22 = vrot.slane %v534_v17, 1  ;;  %v329_v54 = vsel %vm319_vm0, %v276_v16, 0.0 }
 0x1ef   : > { %v522_v23 = vadd.f32 %v521_v6, %v520_v13 }
 0x1f0   : > { %v529_v25 = vadd.f32 %v528_v20, %v527_v14  ;;  %v1001_v27 = vsel %vm1000_vm5, %v515_v21, %v999_v26  ;;  %v536_v24 = vadd.f32 %v535_v22, %v534_v17 }
 0x1f1   : > { %v1003_v28 = vsel %vm1002_vm6, %v522_v23, %v1001_v27 }
 0x1f2   : > { %v1005_v30 = vsel %vm1004_vm7, %v529_v25, %v1003_v28 }
 0x1f3   : > { %v1619_v31 = vsel %vm1006_vm8, %v536_v24, %v1005_v30 }
 0x1f5   : > { %v277_v32 = vpop.trf.xlu1 }
 0x1f6   : > { %v327_v34 = vsel %vm319_vm0, %v277_v32, 0.0 }
 0x1f7   : > { %v328_v35 = vadd.f32 %v327_v34, %v326_v33 }
 0x1f9   : > { %v390_v36 = vrot.slane %v328_v35, 2  ;;  %v391_v37 = vrot.slane %v328_v35, 4  ;;  %v392_v38 = vrot.slane %v328_v35, 6  ;;  %v537_v39 = vsel %vm480_vm1, %v328_v35, 0.0 }
 0x1fa   : > { %v538_v40 = vrot.slane %v537_v39, 4 }
 0x1fb   : > { %v544_v41 = vsel %vm480_vm1, %v390_v36, 0.0  ;;  %v551_v42 = vsel %vm480_vm1, %v391_v37, 0.0  ;;  %v558_v43 = vsel %vm480_vm1, %v392_v38, 0.0 }
 0x1fc   : > { %v539_v44 = vadd.f32 %v538_v40, %v537_v39  ;;  %v545_v46 = vrot.slane %v544_v41, 4  ;;  %v552_v47 = vrot.slane %v551_v42, 4  ;;  %v559_v45 = vrot.slane %v558_v43, 4 }
 0x1fd   : > { %v278_v48 = vpop.trf.xlu1 }
 0x1fe   : > { %v540_v49 = vrot.slane %v539_v44, 2  ;;  %v546_v50 = vadd.f32 %v545_v46, %v544_v41  ;;  %v553_v51 = vadd.f32 %v552_v47, %v551_v42  ;;  %v560_v52 = vadd.f32 %v559_v45, %v558_v43 }
 0x1ff   : > { %v330_v53 = vsel %vm319_vm0, %v278_v48, 0.0 }
 0x200   : > { %v541_v56 = vadd.f32 %v540_v49, %v539_v44  ;;  %v547_v57 = vrot.slane %v546_v50, 2  ;;  %v554_v58 = vrot.slane %v553_v51, 2  ;;  %v331_v59 = vadd.f32 %v330_v53, %v329_v54 }
 0x201   : > { %v561_v61 = vrot.slane %v560_v52, 2 }
 0x202   : > { %v548_v29 = vadd.f32 %v547_v57, %v546_v50  ;;  %v555_v60 = vadd.f32 %v554_v58, %v553_v51  ;;  %v393_v55 = vrot.slane %v331_v59, 2  ;;  %v394_v62 = vrot.slane %v331_v59, 4 }
 0x203   : > { %v395_v1 = vrot.slane %v331_v59, 6  ;;  %v565_v2 = vsel %vm480_vm1, %v331_v59, 0.0  ;;  %v542_v3 = vrot.slane %v541_v56, 1  ;;  %v562_v0 = vadd.f32 %v561_v61, %v560_v52 }
 0x204   : > { %v549_v4 = vrot.slane %v548_v29, 1  ;;  %v556_v63 = vrot.slane %v555_v60, 1  ;;  %v566_v5 = vrot.slane %v565_v2, 4  ;;  %v572_v7 = vsel %vm480_vm1, %v393_v55, 0.0 }
 0x205   : > { %v579_v8 = vsel %vm480_vm1, %v394_v62, 0.0  ;;  %v279_v9 = vpop.trf.xlu1  ;;  %v586_v10 = vsel %vm480_vm1, %v395_v1, 0.0  ;;  %v573_v12 = vrot.slane %v572_v7, 4  ;;  %v543_v16 = vadd.f32 %v542_v3, %v541_v56 }
 0x206   : > { %v550_v11 = vadd.f32 %v549_v4, %v548_v29  ;;  %v580_v13 = vrot.slane %v579_v8, 4  ;;  %v567_v14 = vadd.f32 %v566_v5, %v565_v2  ;;  %v587_v15 = vrot.slane %v586_v10, 4 }
 0x207   : > { %v574_v17 = vadd.f32 %v573_v12, %v572_v7  ;;  %v557_v19 = vadd.f32 %v556_v63, %v555_v60  ;;  %v563_v21 = vrot.slane %v562_v0, 1  ;;  %v332_v50 = vsel %vm319_vm0, %v279_v9, 0.0 }
 0x208   : > { %v581_v18 = vadd.f32 %v580_v13, %v579_v8  ;;  %v568_v6 = vrot.slane %v567_v14, 2  ;;  %v588_v20 = vadd.f32 %v587_v15, %v586_v10  ;;  %v1008_v25 = vsel %vm994_vm2, %v550_v11, %v543_v16 }
 0x209   : > { %v575_v22 = vrot.slane %v574_v17, 2  ;;  %v1009_v34 = vsel %vm996_vm3, %v557_v19, %v1008_v25  ;;  %v564_v35 = vadd.f32 %v563_v21, %v562_v0 }
 0x20a   : > { %v582_v23 = vrot.slane %v581_v18, 2  ;;  %v569_v26 = vadd.f32 %v568_v6, %v567_v14  ;;  %v589_v27 = vrot.slane %v588_v20, 2 }
 0x20b   : > { %v576_v24 = vadd.f32 %v575_v22, %v574_v17  ;;  %v1010_v42 = vsel %vm998_vm4, %v564_v35, %v1009_v34 }
 0x20c   : > { %v583_v28 = vadd.f32 %v582_v23, %v581_v18  ;;  %v570_v30 = vrot.slane %v569_v26, 1  ;;  %v590_v33 = vadd.f32 %v589_v27, %v588_v20 }
 0x20d   : > { %v280_v32 = vpop.trf.xlu1  ;;  %v577_v36 = vrot.slane %v576_v24, 1 }
 0x20e   : > { %v584_v37 = vrot.slane %v583_v28, 1  ;;  %v571_v38 = vadd.f32 %v570_v30, %v569_v26  ;;  %v591_v39 = vrot.slane %v590_v33, 1  ;;  %v335_v5 = vsel %vm319_vm0, %v280_v32, 0.0 }
 0x20f   : > { %v578_v40 = vadd.f32 %v577_v36, %v576_v24 }
 0x210   : > { %v585_v41 = vadd.f32 %v584_v37, %v583_v28  ;;  %v1011_v43 = vsel %vm1000_vm5, %v571_v38, %v1010_v42  ;;  %v592_v44 = vadd.f32 %v591_v39, %v590_v33 }
 0x211   : > { %v1012_v46 = vsel %vm1002_vm6, %v578_v40, %v1011_v43 }
 0x212   : > { %v1013_v47 = vsel %vm1004_vm7, %v585_v41, %v1012_v46 }
 0x213   : > { %v1640_v45 = vsel %vm1006_vm8, %v592_v44, %v1013_v47 }
 0x215   : > { %v281_v48 = vpop.trf.xlu1 }
 0x216   : > { %v333_v49 = vsel %vm319_vm0, %v281_v48, 0.0 }
 0x217   : > { %v334_v51 = vadd.f32 %v333_v49, %v332_v50 }
 0x219   : > { %v396_v52 = vrot.slane %v334_v51, 2  ;;  %v397_v54 = vrot.slane %v334_v51, 4  ;;  %v593_v56 = vsel %vm480_vm1, %v334_v51, 0.0  ;;  %v398_v58 = vrot.slane %v334_v51, 6 }
 0x21a   : > { %v594_v29 = vrot.slane %v593_v56, 4 }
 0x21b   : > { %v600_v57 = vsel %vm480_vm1, %v396_v52, 0.0  ;;  %v607_v59 = vsel %vm480_vm1, %v397_v54, 0.0  ;;  %v614_v62 = vsel %vm480_vm1, %v398_v58, 0.0 }
 0x21c   : > { %v601_v60 = vrot.slane %v600_v57, 4  ;;  %v608_v55 = vrot.slane %v607_v59, 4  ;;  %v595_v1 = vadd.f32 %v594_v29, %v593_v56  ;;  %v615_v3 = vrot.slane %v614_v62, 4 }
 0x21d   : > { %v282_v53 = vpop.trf.xlu1 }
 0x21e   : > { %v602_v2 = vadd.f32 %v601_v60, %v600_v57  ;;  %v336_v4 = vsel %vm319_vm0, %v282_v53, 0.0  ;;  %v609_v63 = vadd.f32 %v608_v55, %v607_v59  ;;  %v596_v7 = vrot.slane %v595_v1, 2 }
 0x21f   : > { %v337_v9 = vadd.f32 %v336_v4, %v335_v5  ;;  %v616_v10 = vadd.f32 %v615_v3, %v614_v62 }
 0x220   : > { %v603_v8 = vrot.slane %v602_v2, 2  ;;  %v610_v0 = vrot.slane %v609_v63, 2  ;;  %v597_v12 = vadd.f32 %v596_v7, %v595_v1 }
 0x221   : > { %v399_v14 = vrot.slane %v337_v9, 2  ;;  %v617_v15 = vrot.slane %v616_v10, 2  ;;  %v400_v16 = vrot.slane %v337_v9, 4  ;;  %v621_v17 = vsel %vm480_vm1, %v337_v9, 0.0 }
 0x222   : > { %v604_v13 = vadd.f32 %v603_v8, %v602_v2  ;;  %v611_v18 = vadd.f32 %v610_v0, %v609_v63  ;;  %v598_v19 = vrot.slane %v597_v12, 1  ;;  %v622_v20 = vrot.slane %v621_v17, 4 }
 0x223   : > { %v628_v21 = vsel %vm480_vm1, %v399_v14, 0.0  ;;  %v618_v22 = vadd.f32 %v617_v15, %v616_v10  ;;  %v635_v23 = vsel %vm480_vm1, %v400_v16, 0.0  ;;  %v401_v27 = vrot.slane %v337_v9, 6 }
 0x224   : > { %v605_v6 = vrot.slane %v604_v13, 1  ;;  %v612_v26 = vrot.slane %v611_v18, 1  ;;  %v629_v30 = vrot.slane %v628_v21, 4  ;;  %v599_v33 = vadd.f32 %v598_v19, %v597_v12 }
 0x225   : > { %v283_v61 = vpop.trf.xlu1  ;;  %v623_v35 = vadd.f32 %v622_v20, %v621_v17  ;;  %v636_v36 = vrot.slane %v635_v23, 4  ;;  %v619_v42 = vrot.slane %v618_v22, 1  ;;  %v642_v44 = vsel %vm480_vm1, %v401_v27, 0.0 }
 0x226   : > { %v338_v24 = vsel %vm319_vm0, %v283_v61, 0.0  ;;  %v606_v34 = vadd.f32 %v605_v6, %v604_v13  ;;  %v613_v41 = vadd.f32 %v612_v26, %v611_v18  ;;  %v630_v46 = vadd.f32 %v629_v30, %v628_v21 }
 0x227   : > { %v624_v54 = vrot.slane %v623_v35, 2  ;;  %v637_v57 = vadd.f32 %v636_v36, %v635_v23  ;;  %v643_v58 = vrot.slane %v642_v44, 4  ;;  %v620_v2 = vadd.f32 %v619_v42, %v618_v22 }
 0x228   : > { %v1015_v59 = vsel %vm994_vm2, %v606_v34, %v599_v33  ;;  %v631_v62 = vrot.slane %v630_v46, 2 }
 0x229   : > { %v638_v8 = vrot.slane %v637_v57, 2  ;;  %v644_v9 = vadd.f32 %v643_v58, %v642_v44  ;;  %v1016_v10 = vsel %vm996_vm3, %v613_v41, %v1015_v59  ;;  %v625_v0 = vadd.f32 %v624_v54, %v623_v35 }
 0x22a   : > { %v632_v20 = vadd.f32 %v631_v62, %v630_v46  ;;  %v1017_v54 = vsel %vm998_vm4, %v620_v2, %v1016_v10 }
 0x22b   : > { %v626_v30 = vrot.slane %v625_v0, 1  ;;  %v645_v34 = vrot.slane %v644_v9, 2 }
 0x22c   : > { %v633_v42 = vrot.slane %v632_v20, 1 }
 0x22d   : > { %v284_v11 = vpop.trf.xlu1 }
 0x22e   : > { %v341_v3 = vsel %vm319_vm0, %v284_v11, 0.0 }
 0x235   : > { %v285_v25 = vpop.trf.xlu1 }
 0x236   : > { %v339_v28 = vsel %vm319_vm0, %v285_v25, 0.0 }
 0x237   : > { %v340_v32 = vadd.f32 %v339_v28, %v338_v24 }
 0x239   : > { %v402_v37 = vrot.slane %v340_v32, 2  ;;  %v403_v38 = vrot.slane %v340_v32, 4  ;;  %v404_v39 = vrot.slane %v340_v32, 6  ;;  %v649_v40 = vsel %vm480_vm1, %v340_v32, 0.0 }
 0x23a   : > { %v650_v43 = vrot.slane %v649_v40, 4 }
 0x23b   : > { %v656_v47 = vsel %vm480_vm1, %v402_v37, 0.0  ;;  %v663_v48 = vsel %vm480_vm1, %v403_v38, 0.0  ;;  %v670_v49 = vsel %vm480_vm1, %v404_v39, 0.0  ;;  %v639_v38 = vadd.f32 %v638_v8, %v637_v57 }
 0x23c   : > { %v651_v50 = vadd.f32 %v650_v43, %v649_v40  ;;  %v657_v51 = vrot.slane %v656_v47, 4  ;;  %v664_v52 = vrot.slane %v663_v48, 4  ;;  %v671_v53 = vrot.slane %v670_v49, 4 }
 0x23d   : > { %v286_v56 = vpop.trf.xlu1  ;;  %v640_v59 = vrot.slane %v639_v38, 1 }
 0x23e   : > { %v652_v29 = vrot.slane %v651_v50, 2  ;;  %v658_v60 = vadd.f32 %v657_v51, %v656_v47  ;;  %v665_v61 = vadd.f32 %v664_v52, %v663_v48  ;;  %v672_v55 = vadd.f32 %v671_v53, %v670_v49 }
 0x23f   : > { %v342_v1 = vsel %vm319_vm0, %v286_v56, 0.0  ;;  %v646_v53 = vadd.f32 %v645_v34, %v644_v9  ;;  %v641_v2 = vadd.f32 %v640_v59, %v639_v38 }
 0x240   : > { %v653_v4 = vadd.f32 %v652_v29, %v651_v50  ;;  %v659_v63 = vrot.slane %v658_v60, 2  ;;  %v666_v5 = vrot.slane %v665_v61, 2  ;;  %v343_v7 = vadd.f32 %v342_v1, %v341_v3 }
 0x241   : > { %v673_v14 = vrot.slane %v672_v55, 2  ;;  %v627_v50 = vadd.f32 %v626_v30, %v625_v0  ;;  %v647_v10 = vrot.slane %v646_v53, 1 }
 0x242   : > { %v660_v12 = vadd.f32 %v659_v63, %v658_v60  ;;  %v667_v13 = vadd.f32 %v666_v5, %v665_v61  ;;  %v405_v15 = vrot.slane %v343_v7, 2  ;;  %v406_v16 = vrot.slane %v343_v7, 4 }
 0x243   : > { %v407_v17 = vrot.slane %v343_v7, 6  ;;  %v677_v18 = vsel %vm480_vm1, %v343_v7, 0.0  ;;  %v654_v19 = vrot.slane %v653_v4, 1  ;;  %v674_v27 = vadd.f32 %v673_v14, %v672_v55 }
 0x244   : > { %v661_v6 = vrot.slane %v660_v12, 1  ;;  %v668_v11 = vrot.slane %v667_v13, 1  ;;  %v678_v21 = vrot.slane %v677_v18, 4  ;;  %v684_v22 = vsel %vm480_vm1, %v405_v15, 0.0 }
 0x245   : > { %v691_v23 = vsel %vm480_vm1, %v406_v16, 0.0  ;;  %v698_v25 = vsel %vm480_vm1, %v407_v17, 0.0  ;;  %v685_v24 = vrot.slane %v684_v22, 4  ;;  %v655_v35 = vadd.f32 %v654_v19, %v653_v4  ;;  %v929_v17 = vld [vmem:[%s1732_s3] sm:$0xf] }
 0x246   : > { %v662_v26 = vadd.f32 %v661_v6, %v660_v12  ;;  %v692_v28 = vrot.slane %v691_v23, 4  ;;  %v679_v32 = vadd.f32 %v678_v21, %v677_v18  ;;  %v699_v33 = vrot.slane %v698_v25, 4 }
 0x247   : > { %v686_v36 = vadd.f32 %v685_v24, %v684_v22  ;;  %v669_v39 = vadd.f32 %v668_v11, %v667_v13  ;;  %v675_v43 = vrot.slane %v674_v27, 1  ;;  %v634_v55 = vadd.f32 %v633_v42, %v632_v20 }
 0x248   : > { %v693_v37 = vadd.f32 %v692_v28, %v691_v23  ;;  %v680_v40 = vrot.slane %v679_v32, 2  ;;  %v700_v41 = vadd.f32 %v699_v33, %v698_v25  ;;  %v1022_v47 = vsel %vm994_vm2, %v662_v26, %v655_v35 }
 0x249   : > { %v687_v44 = vrot.slane %v686_v36, 2  ;;  %v1023_v57 = vsel %vm996_vm3, %v669_v39, %v1022_v47  ;;  %v676_v29 = vadd.f32 %v675_v43, %v674_v27  ;;  %v1018_v3 = vsel %vm1000_vm5, %v627_v50, %v1017_v54 }
 0x24a   : > { %v694_v46 = vrot.slane %v693_v37, 2  ;;  %v681_v48 = vadd.f32 %v680_v40, %v679_v32  ;;  %v701_v49 = vrot.slane %v700_v41, 2  ;;  %v1019_v0 = vsel %vm1002_vm6, %v634_v55, %v1018_v3 }
 0x24b   : > { %v688_v51 = vadd.f32 %v687_v44, %v686_v36  ;;  %v1024_v5 = vsel %vm998_vm4, %v676_v29, %v1023_v57  ;;  %v1020_v14 = vsel %vm1004_vm7, %v641_v2, %v1019_v0  ;;  %v648_v15 = vadd.f32 %v647_v10, %v646_v53 }
 0x24c   : > { %v695_v52 = vadd.f32 %v694_v46, %v693_v37  ;;  %v682_v56 = vrot.slane %v681_v48, 1  ;;  %v702_v58 = vadd.f32 %v701_v49, %v700_v41 }
 0x24d   : > { %v689_v60 = vrot.slane %v688_v51, 1  ;;  %v1021_v16 = vsel %vm1006_vm8, %v648_v15, %v1020_v14 }
 0x24e   : > { %v696_v61 = vrot.slane %v695_v52, 1  ;;  %v683_v62 = vadd.f32 %v682_v56, %v681_v48  ;;  %v703_v1 = vrot.slane %v702_v58, 1 }
 0x24f   : > { %v690_v4 = vadd.f32 %v689_v60, %v688_v51 }
 0x250   : > { %v697_v63 = vadd.f32 %v696_v61, %v695_v52  ;;  %v1025_v7 = vsel %vm1000_vm5, %v683_v62, %v1024_v5  ;;  %v704_v8 = vadd.f32 %v703_v1, %v702_v58 }
 0x251   : > { %v1026_v9 = vsel %vm1002_vm6, %v690_v4, %v1025_v7 }
 0x252   : > { %v1027_v12 = vsel %vm1004_vm7, %v697_v63, %v1026_v9 }
 0x253   : > { %v1028_v13 = vsel %vm1006_vm8, %v704_v8, %v1027_v12 }
 0x254   : > { %1211 = vmatpush.xpose.msk.msra.mxu0 %vm319_vm0, %v1028_v13 }
 0x258   : > { %1212 = vmatpush.xpose.msk.msra.mxu0 %vm319_vm0, %v1021_v16 }
 0x25c   : > { %1213 = vmatpush.xpose.msk.msra.mxu0 %vm319_vm0, %v1640_v45 }
 0x260   : > { %1214 = vmatpush.xpose.msk.msra.mxu0 %vm319_vm0, %v1619_v31 }
 0x263   : > { %1215 = vmatmul.msk.f32.vlgmr.msra.gmra.mxu0 %vm319_vm0, %v929_v17 }
 0x2e0   : > { %v1093_v31 = vpop.f32.mrf.mxu0 }
 0x2e1   : > { %1097 = vst.msk [vmem:[%s233_s14] sm:$0xf] %vm1096_vm9, %v1093_v31 }
 0x2e2   : > { %1343 = shalt.err (!%p1340_p13)
}
 0x2e3   : > { %1223 = dma.vmem_to_hbm [thread:$0]  (%p1477_p9), %s1113_s22, 64, %s1115_s24, %s1099_s26  }
 0x2e4 PF: > { %s1126_s21 = sand.u32 1, %s1378_s15   ;;  %p1230_p0 = pnand %p1200_p12, %p1484_p11 }
 0x2e5   : > { %s1127_s9 = scalar_lea.sflag [#allocation4], %s1126_s21 }
 0x2e6   : > { %p1231_p1 = pneg %p1230_p0 }
 0x2e8   : > { %1373 = dma.done.wait (%p1231_p1), %s1127_s9, 64  }
 0x2e9   : > { %1375 = vsyncadd (%p1231_p1), %s1127_s9, 4294967232  ;;  %s20_s20 = sadd.s32 1, %s1398_s20   ;;  %s1738_s15 = smov %s1382_s16 }
 0x2ea   : > { %p17_p2 = scmp.ge.s32.totalorder %s20_s20, 4   ;;  %s1739_s16 = smov %s1386_s17 }
 0x2eb   : > { %s1740_s17 = smov %s1482_s29  ;;  %s1741_s18 = smov %s1394_s19 }
 0x2ec   : > { %s1742_s19 = smov %s1744_s23  ;;  %19 = sbr.rel (!%p17_p2) target bundleno = 6 (0x6), region = 81 }
 0x2f1   :  { %1133 = vsyncpa [#allocation3], 1 }
 0x2f2   :  { %1135 = vsyncpa [#allocation3 + $0x1], 1 }
 0x2f3   :  { %1136 = vsyncpa [#allocation4], 1 }
 0x2f4   :  { %1138 = vsyncpa [#allocation4 + $0x1], 1 }

</bundles_post_ra>
